<compile_context>
chip_gen: v7x
topology: tpu7x:2x2x1
jax: 0.10.0
libtpu: 0.0.40
codegen_flags: <defaults>
</compile_context>

<pallas_src>
import functools

import jax
import jax.numpy as jnp
from jax.experimental import pallas as pl
from jax.experimental.pallas import tpu as pltpu

_MIB = 1024 * 1024


def _round_up(v, m):
    return ((v + m - 1) // m) * m


# ----------------------------------------------------------------------------------
# Kernel bodies
# ----------------------------------------------------------------------------------
def _ln_rows(t_ref, gamma, beta, eps, d_true):
    """LayerNorm each row of a (rows, D_pad) tile over the first `d_true` lanes.

    Two-pass statistics (mean, then sum((t - mean)^2)) to match torch.nn.LayerNorm
    numerics (avoids E[x^2]-E[x]^2 cancellation).  Lanes >= d_true (feature padding)
    are masked out of the reductions; gamma/beta padding is 0 so padded lanes emit 0
    and the wrapper slices them off.
    """
    t = t_ref[...].astype(jnp.float32)
    d_pad = t.shape[-1]
    inv_d = 1.0 / float(d_true)
    if d_pad != d_true:
        lane = jax.lax.broadcasted_iota(jnp.int32, t.shape, t.ndim - 1)
        valid = lane < d_true
        t = jnp.where(valid, t, 0.0)
    mean = jnp.sum(t, axis=-1, keepdims=True) * inv_d
    centered = t - mean
    if d_pad != d_true:
        centered = jnp.where(valid, centered, 0.0)
    var = jnp.sum(centered * centered, axis=-1, keepdims=True) * inv_d
    inv = jax.lax.rsqrt(var + eps)
    return centered * inv * gamma + beta


def _prenorm_fused_kernel(x_ref, y_ref, g_ref, b_ref, o_ref, *, eps, d_true, fuse_fn):
    gamma = g_ref[...].astype(jnp.float32)
    beta = b_ref[...].astype(jnp.float32)
    nx = _ln_rows(x_ref, gamma, beta, eps, d_true)
    ny = _ln_rows(y_ref, gamma, beta, eps, d_true)
    o_ref[...] = fuse_fn(nx, ny).astype(o_ref.dtype)


def _prenorm_dual_kernel(x_ref, y_ref, g_ref, b_ref, ox_ref, oy_ref, *, eps, d_true):
    gamma = g_ref[...].astype(jnp.float32)
    beta = b_ref[...].astype(jnp.float32)
    ox_ref[...] = _ln_rows(x_ref, gamma, beta, eps, d_true).astype(ox_ref.dtype)
    oy_ref[...] = _ln_rows(y_ref, gamma, beta, eps, d_true).astype(oy_ref.dtype)


# ----------------------------------------------------------------------------------
# Generation-aware VMEM / tiling plan
# ----------------------------------------------------------------------------------
def _vmem_plan():
    """Block-buffer budget + scoped VMEM limit, sized per TPU generation."""
    cap = None
    try:
        cap = getattr(pltpu.get_tpu_info(), "vmem_capacity_bytes", None)
    except Exception:
        cap = None
    if cap is None:
        cap = 64 * _MIB  # conservative default: assume v7x-sized VMEM
    if cap >= 96 * _MIB:
        # v5e / v6e: 128 MiB physical VMEM, single TensorCore per chip.
        return {"block_budget": 16 * _MIB, "vmem_limit": 56 * _MIB, "multi_core": False}
    # v7x: 64 MiB physical VMEM, 2 TensorCores share the ("parallel",) grid.
    return {"block_budget": 12 * _MIB, "vmem_limit": 44 * _MIB, "multi_core": True}


def _pick_rows_per_block(n_rows, d_pad, itemsize, n_block_arrays, *,
                         block_budget_bytes, multi_core):
    # Dtype-aware sublane packing: bf16 packs 2 rows / sublane, int8/fp8 pack 4.
    align = {1: 32, 2: 16}.get(itemsize, 8)
    # Per-row VMEM cost: double-buffered block buffers for every blocked array PLUS
    # ~4 f32 compute tiles (upcast t, centered, first LN result, ...) live at peak.
    n_f32_temps = 4
    bytes_per_row = d_pad * (itemsize * n_block_arrays * 2 + 4 * n_f32_temps)
    rows = block_budget_bytes // max(1, bytes_per_row)
    rows = max(align, min(int(rows), 4096))
    rows -= rows % align
    if multi_core:
        # Keep the 1-D "parallel" grid >= 4 steps for large inputs so neither
        # v7x TensorCore goes idle / badly imbalanced.
        min_blocks = 4
        if n_rows >= min_blocks * align:
            rows = min(rows, _round_up(pl.cdiv(n_rows, min_blocks), align))
    rows = min(rows, _round_up(n_rows, align))
    return max(align, rows)


# ----------------------------------------------------------------------------------
# Wrapper
# ----------------------------------------------------------------------------------
def prenorm_pallas(x, y, gamma, beta, *, eps=1e-5, fuse_fn=None, rows_per_block=None):
    """LayerNorm(x) and LayerNorm(y) over the last dim (shared gamma/beta) in one
    Pallas kernel.  If `fuse_fn` (elementwise, shape-preserving) is given, returns
    fuse_fn(LN(x), LN(y)); otherwise returns (LN(x), LN(y))."""
    assert x.shape == y.shape, "PreNorm applies the same LayerNorm to x and y"
    orig_shape = x.shape
    d = orig_shape[-1]
    d_pad = _round_up(d, 128)  # lane-dense feature axis -> unmasked full-width stores

    x2 = x.reshape(-1, d)  # no copy for contiguous input; no row padding
    y2 = y.reshape(-1, d)
    n_rows = x2.shape[0]
    g2 = gamma.reshape(1, d).astype(jnp.float32)
    b2 = beta.reshape(1, d).astype(jnp.float32)
    if d_pad != d:
        pad = ((0, 0), (0, d_pad - d))
        x2 = jnp.pad(x2, pad)
        y2 = jnp.pad(y2, pad)
        g2 = jnp.pad(g2, pad)
        b2 = jnp.pad(b2, pad)

    fused = fuse_fn is not None
    n_out = 1 if fused else 2
    n_block_arrays = 2 + n_out  # x, y row tiles + output row tile(s)
    itemsize = jnp.dtype(x.dtype).itemsize

    plan = _vmem_plan()
    if rows_per_block is None:
        rows_per_block = _pick_rows_per_block(
            n_rows, d_pad, itemsize, n_block_arrays,
            block_budget_bytes=plan["block_budget"],
            multi_core=plan["multi_core"],
        )

    # Ragged last block: cdiv grid + masked boundary writes instead of pad/slice rows.
    grid = (pl.cdiv(n_rows, rows_per_block),)
    row_spec = pl.BlockSpec((rows_per_block, d_pad), lambda i: (i, 0))
    vec_spec = pl.BlockSpec((1, d_pad), lambda i: (0, 0))
    # TODO(synk): if a v6e profile shows exposed input DMA at step boundaries, sweep
    # pipeline_mode=pl.Buffered(3) on the two row-tile input specs (not on v7x).

    cp = pltpu.CompilerParams(
        # 1-D parallel row axis: lets v7x shard blocks across its 2 TensorCores;
        # neutral on v5e/v6e.
        dimension_semantics=("parallel",),
        vmem_limit_bytes=plan["vmem_limit"],
    )
    # Memory-bound hint for XLA's scheduler (helps overlap neighboring HLO).
    cost = pl.CostEstimate(
        flops=10 * n_rows * d_pad,
        transcendentals=2 * n_rows,
        bytes_accessed=(2 + n_out) * n_rows * d_pad * itemsize + 2 * d_pad * 4,
    )

    if fused:
        out = pl.pallas_call(
            functools.partial(_prenorm_fused_kernel, eps=eps, d_true=d, fuse_fn=fuse_fn),
            out_shape=jax.ShapeDtypeStruct((n_rows, d_pad), x.dtype),
            grid_spec=pltpu.PrefetchScalarGridSpec(
                num_scalar_prefetch=0,
                grid=grid,
                in_specs=[row_spec, row_spec, vec_spec, vec_spec],
                out_specs=row_spec,
            ),
            compiler_params=cp,
            cost_estimate=cost,
        )(x2, y2, g2, b2)
        if d_pad != d:
            out = out[:, :d]
        return out.reshape(orig_shape)

    nx, ny = pl.pallas_call(
        functools.partial(_prenorm_dual_kernel, eps=eps, d_true=d),
        out_shape=(
            jax.ShapeDtypeStruct((n_rows, d_pad), x.dtype),
            jax.ShapeDtypeStruct((n_rows, d_pad), y.dtype),
        ),
        grid_spec=pltpu.PrefetchScalarGridSpec(
            num_scalar_prefetch=0,
            grid=grid,
            in_specs=[row_spec, row_spec, vec_spec, vec_spec],
            out_specs=[row_spec, row_spec],
        ),
        compiler_params=cp,
        cost_estimate=cost,
    )(x2, y2, g2, b2)
    if d_pad != d:
        nx = nx[:, :d]
        ny = ny[:, :d]
    return nx.reshape(orig_shape), ny.reshape(orig_shape)


class PreNormPallas:
    """JAX/Pallas equivalent of:
        class PreNorm(nn.Module):
            def __init__(self, dim, fn): self.norm = nn.LayerNorm(dim); self.fn = fn
            def forward(self, x, y, **kw): return self.fn(self.norm(x), self.norm(y), **kw)
    The same LayerNorm parameters are applied to both x and y (single nn.LayerNorm).
    If `fuse_elementwise=True`, `fn` must be elementwise/shape-preserving and is fused
    into the kernel epilogue; otherwise `fn` runs as plain JAX on the two LN outputs.
    """

    def __init__(self, dim, fn, gamma=None, beta=None, eps=1e-5, fuse_elementwise=False):
        self.dim = dim
        self.fn = fn
        self.eps = eps
        self.fuse_elementwise = fuse_elementwise
        # PyTorch default init is ones/zeros; allow deterministic overrides.
        self.gamma = gamma if gamma is not None else jnp.ones((dim,), jnp.float32)
        self.beta = beta if beta is not None else jnp.zeros((dim,), jnp.float32)

    def __call__(self, x, y, **kwargs):
        if self.fuse_elementwise and not kwargs:
            return prenorm_pallas(
                x, y, self.gamma, self.beta, eps=self.eps, fuse_fn=self.fn
            )
        nx, ny = prenorm_pallas(x, y, self.gamma, self.beta, eps=self.eps)
        return self.fn(nx, ny, **kwargs)


if __name__ == "__main__":
    key = jax.random.PRNGKey(0)
    k1, k2, k3, k4 = jax.random.split(key, 4)

    B, N = 2, 8  # batch, sequence length (small demo shapes)

    def ln_ref(t, gamma, beta, eps=1e-5):
        mu = jnp.mean(t, axis=-1, keepdims=True)
        var = jnp.mean((t - mu) ** 2, axis=-1, keepdims=True)
        return (t - mu) / jnp.sqrt(var + eps) * gamma + beta

    # TODO(synk): `fn` is an arbitrary wrapped module (Attention/FeedForward in the
    # original ViT); here it is a simple deterministic elementwise fn, which we can
    # fuse straight into the kernel epilogue.
    fn = lambda a, b: a + b

    # D=32 exercises the lane-padded (D % 128 != 0) path; D=128 the lane-dense path.
    for D in (32, 128):
        x = jax.random.normal(k1, (B, N, D), jnp.float32)
        y = jax.random.normal(k2, (B, N, D), jnp.float32)
        gamma = 1.0 + 0.1 * jax.random.normal(k3, (D,), jnp.float32)
        beta = 0.1 * jax.random.normal(k4, (D,), jnp.float32)

        # Fused path: one kernel producing fn(LN(x), LN(y)).
        module = PreNormPallas(D, fn, gamma=gamma, beta=beta, fuse_elementwise=True)
        out = module(x, y)
        jax.block_until_ready(out)

        # General-fn path: one kernel producing both LN outputs, fn in plain JAX.
        module_general = PreNormPallas(D, fn, gamma=gamma, beta=beta,
                                       fuse_elementwise=False)
        out_general = module_general(x, y)
        jax.block_until_ready(out_general)

        ref = fn(ln_ref(x, gamma, beta), ln_ref(y, gamma, beta))
        assert out.shape == (B, N, D)
        assert jnp.max(jnp.abs(out - ref)) < 1e-4, f"fused mismatch at D={D}"
        assert jnp.max(jnp.abs(out_general - ref)) < 1e-4, f"dual mismatch at D={D}"

    print("KERNEL_OK")
</pallas_src>

<mosaic_0001>
module attributes {stable_mosaic.version = 11 : i64} {
  func.func @_prenorm_fused_kernel(%arg0: i32, %arg1: memref<16x128xf32, #tpu.memory_space<vmem>>, %arg2: memref<16x128xf32, #tpu.memory_space<vmem>>, %arg3: memref<1x128xf32, #tpu.memory_space<vmem>>, %arg4: memref<1x128xf32, #tpu.memory_space<vmem>>, %arg5: memref<16x128xf32, #tpu.memory_space<vmem>>) attributes {dimension_semantics = [#tpu.dimension_semantics<parallel>], iteration_bounds = array<i64: 1>, scalar_prefetch = 0 : i64, scratch_operands = 0 : i64, tpu.core_type = #tpu.core_type<tc>, window_params = [{transform_indices = @transform_0, window_bounds = array<i64: 16, 128>}, {transform_indices = @transform_1, window_bounds = array<i64: 16, 128>}, {pipeline_mode = #tpu.pipeline_mode<synchronous>, transform_indices = @transform_2, window_bounds = array<i64: 1, 128>}, {pipeline_mode = #tpu.pipeline_mode<synchronous>, transform_indices = @transform_3, window_bounds = array<i64: 1, 128>}, {transform_indices = @transform_4, window_bounds = array<i64: 16, 128>}]} {
    %c0 = arith.constant 0 : index
    %c0_0 = arith.constant 0 : index
    %0 = vector.load %arg3[%c0, %c0_0] : memref<1x128xf32, #tpu.memory_space<vmem>>, vector<1x128xf32>
    %c0_1 = arith.constant 0 : index
    %c0_2 = arith.constant 0 : index
    %1 = vector.load %arg4[%c0_1, %c0_2] : memref<1x128xf32, #tpu.memory_space<vmem>>, vector<1x128xf32>
    %c0_3 = arith.constant 0 : index
    %c0_4 = arith.constant 0 : index
    %2 = vector.load %arg1[%c0_3, %c0_4] : memref<16x128xf32, #tpu.memory_space<vmem>>, vector<16x128xf32>
    %3 = tpu.iota {dimensions = array<i32: 1>} : vector<16x128xi32>
    %c32_i32 = arith.constant 32 : i32
    %4 = vector.broadcast %c32_i32 : i32 to vector<16x128xi32>
    %5 = arith.cmpi slt, %3, %4 : vector<16x128xi32>
    %cst = arith.constant 0.000000e+00 : f32
    %6 = vector.broadcast %cst : f32 to vector<16x128xf32>
    %7 = arith.select %5, %2, %6 : vector<16x128xi1>, vector<16x128xf32>
    %cst_5 = arith.constant dense<0.000000e+00> : vector<16xf32>
    %8 = vector.multi_reduction <add>, %7, %cst_5 [1] : vector<16x128xf32> to vector<16xf32>
    %9 = vector.shape_cast %8 : vector<16xf32> to vector<16x1xf32>
    %cst_6 = arith.constant 3.125000e-02 : f32
    %10 = vector.broadcast %cst_6 : f32 to vector<16x1xf32>
    %11 = arith.mulf %9, %10 : vector<16x1xf32>
    %12 = vector.broadcast %11 : vector<16x1xf32> to vector<16x128xf32>
    %13 = arith.subf %7, %12 : vector<16x128xf32>
    %cst_7 = arith.constant 0.000000e+00 : f32
    %14 = vector.broadcast %cst_7 : f32 to vector<16x128xf32>
    %15 = arith.select %5, %13, %14 : vector<16x128xi1>, vector<16x128xf32>
    %16 = arith.mulf %15, %15 : vector<16x128xf32>
    %cst_8 = arith.constant dense<0.000000e+00> : vector<16xf32>
    %17 = vector.multi_reduction <add>, %16, %cst_8 [1] : vector<16x128xf32> to vector<16xf32>
    %18 = vector.shape_cast %17 : vector<16xf32> to vector<16x1xf32>
    %cst_9 = arith.constant 3.125000e-02 : f32
    %19 = vector.broadcast %cst_9 : f32 to vector<16x1xf32>
    %20 = arith.mulf %18, %19 : vector<16x1xf32>
    %cst_10 = arith.constant 9.99999974E-6 : f32
    %21 = vector.broadcast %cst_10 : f32 to vector<16x1xf32>
    %22 = arith.addf %20, %21 : vector<16x1xf32>
    %23 = math.rsqrt %22 : vector<16x1xf32>
    %24 = vector.broadcast %23 : vector<16x1xf32> to vector<16x128xf32>
    %25 = arith.mulf %15, %24 : vector<16x128xf32>
    %26 = vector.broadcast %0 : vector<1x128xf32> to vector<16x128xf32>
    %27 = arith.mulf %25, %26 : vector<16x128xf32>
    %28 = vector.broadcast %1 : vector<1x128xf32> to vector<16x128xf32>
    %29 = arith.addf %27, %28 : vector<16x128xf32>
    %c0_11 = arith.constant 0 : index
    %c0_12 = arith.constant 0 : index
    %30 = vector.load %arg2[%c0_11, %c0_12] : memref<16x128xf32, #tpu.memory_space<vmem>>, vector<16x128xf32>
    %31 = tpu.iota {dimensions = array<i32: 1>} : vector<16x128xi32>
    %c32_i32_13 = arith.constant 32 : i32
    %32 = vector.broadcast %c32_i32_13 : i32 to vector<16x128xi32>
    %33 = arith.cmpi slt, %31, %32 : vector<16x128xi32>
    %cst_14 = arith.constant 0.000000e+00 : f32
    %34 = vector.broadcast %cst_14 : f32 to vector<16x128xf32>
    %35 = arith.select %33, %30, %34 : vector<16x128xi1>, vector<16x128xf32>
    %cst_15 = arith.constant dense<0.000000e+00> : vector<16xf32>
    %36 = vector.multi_reduction <add>, %35, %cst_15 [1] : vector<16x128xf32> to vector<16xf32>
    %37 = vector.shape_cast %36 : vector<16xf32> to vector<16x1xf32>
    %cst_16 = arith.constant 3.125000e-02 : f32
    %38 = vector.broadcast %cst_16 : f32 to vector<16x1xf32>
    %39 = arith.mulf %37, %38 : vector<16x1xf32>
    %40 = vector.broadcast %39 : vector<16x1xf32> to vector<16x128xf32>
    %41 = arith.subf %35, %40 : vector<16x128xf32>
    %cst_17 = arith.constant 0.000000e+00 : f32
    %42 = vector.broadcast %cst_17 : f32 to vector<16x128xf32>
    %43 = arith.select %33, %41, %42 : vector<16x128xi1>, vector<16x128xf32>
    %44 = arith.mulf %43, %43 : vector<16x128xf32>
    %cst_18 = arith.constant dense<0.000000e+00> : vector<16xf32>
    %45 = vector.multi_reduction <add>, %44, %cst_18 [1] : vector<16x128xf32> to vector<16xf32>
    %46 = vector.shape_cast %45 : vector<16xf32> to vector<16x1xf32>
    %cst_19 = arith.constant 3.125000e-02 : f32
    %47 = vector.broadcast %cst_19 : f32 to vector<16x1xf32>
    %48 = arith.mulf %46, %47 : vector<16x1xf32>
    %cst_20 = arith.constant 9.99999974E-6 : f32
    %49 = vector.broadcast %cst_20 : f32 to vector<16x1xf32>
    %50 = arith.addf %48, %49 : vector<16x1xf32>
    %51 = math.rsqrt %50 : vector<16x1xf32>
    %52 = vector.broadcast %51 : vector<16x1xf32> to vector<16x128xf32>
    %53 = arith.mulf %43, %52 : vector<16x128xf32>
    %54 = vector.broadcast %0 : vector<1x128xf32> to vector<16x128xf32>
    %55 = arith.mulf %53, %54 : vector<16x128xf32>
    %56 = vector.broadcast %1 : vector<1x128xf32> to vector<16x128xf32>
    %57 = arith.addf %55, %56 : vector<16x128xf32>
    %58 = arith.addf %29, %57 : vector<16x128xf32>
    %c0_21 = arith.constant 0 : index
    %c0_22 = arith.constant 0 : index
    %59 = vector.load %arg5[%c0_21, %c0_22] : memref<16x128xf32, #tpu.memory_space<vmem>>, vector<16x128xf32>
    tpu.vector_store %arg5[%c0_21, %c0_22], %58 {strides = array<i32>} : memref<16x128xf32, #tpu.memory_space<vmem>>, vector<16x128xf32>,
    return
  }
  func.func @transform_0(%arg0: i32) -> (i32, i32) {
    %c0_i32 = arith.constant 0 : i32
    %c0_i32_0 = arith.constant 0 : i32
    return %arg0, %c0_i32 : i32, i32
  }
  func.func @transform_1(%arg0: i32) -> (i32, i32) {
    %c0_i32 = arith.constant 0 : i32
    %c0_i32_0 = arith.constant 0 : i32
    return %arg0, %c0_i32 : i32, i32
  }
  func.func @transform_2(%arg0: i32) -> (i32, i32) {
    %c0_i32 = arith.constant 0 : i32
    %c0_i32_0 = arith.constant 0 : i32
    %c0_i32_1 = arith.constant 0 : i32
    return %c0_i32, %c0_i32_0 : i32, i32
  }
  func.func @transform_3(%arg0: i32) -> (i32, i32) {
    %c0_i32 = arith.constant 0 : i32
    %c0_i32_0 = arith.constant 0 : i32
    %c0_i32_1 = arith.constant 0 : i32
    return %c0_i32, %c0_i32_0 : i32, i32
  }
  func.func @transform_4(%arg0: i32) -> (i32, i32) {
    %c0_i32 = arith.constant 0 : i32
    %c0_i32_0 = arith.constant 0 : i32
    return %arg0, %c0_i32 : i32, i32
  }
}

</mosaic_0001>

<bundles_post_ra>
// kernel: tpu_custom_call.1
= control target key start
LH: loop header
LB: loop body
LE: loop exit
PB: predicated region body
PF: predicated region fallthrough
CT: control target
= control target key end

     0   :  { %9 = vsyncpa [#allocation3], 0  ;;  %s325_s0 = inlined_call_operand.hbm [shape: f32[16,128], index: 0, kind: input, shape index: {}]   ;;  %s326_s1 = inlined_call_operand.hbm [shape: f32[16,128], index: 1, kind: input, shape index: {}]   ;;  %s327_s2 = inlined_call_operand.vmem [shape: f32[1,128], index: 2, kind: input, shape index: {}]   ;;  %s328_s3 = inlined_call_operand.vmem [shape: f32[1,128], index: 3, kind: input, shape index: {}]   ;;  %s329_s4 = inlined_call_operand.hbm [shape: f32[16,128], index: 4, kind: output, shape index: {}]  }
   0x1   :  { %10 = vsyncpa [#allocation6], 0 }
   0x2   :  { %11 = vsyncpa [#allocation4], 0  ;;  %s236_s15 = smov [#allocation2]   ;;  %s164_s19 = scalar_lea.hbm %s325_s0, 256 }
   0x3   :  { %s17_s16 = sshll.u32 %s236_s15, 4  ;;  %p165_p0 = scmp.ne.s32.totalorder %s325_s0, %s164_s19  ;;  %s18_s16 = int_to_ptr.vmem [resolvable:$true] %s17_s16 }
   0x4   :  { %p168_p1 = scmp.lt.u32.totalorder %s164_s19, %s325_s0 }
   0x6   :  { %p170_p2 = pnand %p168_p1, %p165_p0 }
   0x8   :  { %173 = shalt.err (!%p170_p2)
}
   0x9   :  { %s174_s24 = scalar_lea.vmem %s18_s16, 256  ;;  %p179_p4 = scmp.lt.s32.totalorder %s18_s16, %s18_s16 }
   0xa   :  { %p175_p3 = scmp.ne.s32.totalorder %s18_s16, %s174_s24  ;;  %p180_p5 = scmp.lt.s32.totalorder %s174_s24, %s174_s24 }
   0xc   :  { %p181_p6 = por %p180_p5, %p179_p4 }
   0xe   :  { %p182_p7 = pnand %p181_p6, %p175_p3 }
  0x10   :  { %185 = shalt.err (!%p182_p7)
}
  0x11   :  { %s237_s25 = smov 128   ;;  %s238_s26 = smov 8  }
  0x12   :  { %23 = dma.hbm_to_vmem [thread:$0]  %s325_s0, 256, %s18_s16, [#allocation3], %s237_s25, %s237_s25, %s238_s26  }
  0x13   :  { %s239_s29 = smov [#allocation5]   ;;  %s186_s7 = scalar_lea.hbm %s326_s1, 256 }
  0x14   :  { %s29_s30 = sshll.u32 %s239_s29, 4  ;;  %p187_p8 = scmp.ne.s32.totalorder %s326_s1, %s186_s7  ;;  %s30_s30 = int_to_ptr.vmem [resolvable:$true] %s29_s30 }
  0x15   :  { %p190_p9 = scmp.lt.u32.totalorder %s186_s7, %s326_s1 }
  0x17   :  { %p192_p10 = pnand %p190_p9, %p187_p8 }
  0x19   :  { %195 = shalt.err (!%p192_p10)
}
  0x1a   :  { %s196_s12 = scalar_lea.vmem %s30_s30, 256  ;;  %p201_p12 = scmp.lt.s32.totalorder %s30_s30, %s30_s30 }
  0x1b   :  { %p197_p11 = scmp.ne.s32.totalorder %s30_s30, %s196_s12  ;;  %p202_p13 = scmp.lt.s32.totalorder %s196_s12, %s196_s12 }
  0x1d   :  { %p203_p0 = por %p202_p13, %p201_p12 }
  0x1f   :  { %p204_p1 = pnand %p203_p0, %p197_p11 }
  0x21   :  { %207 = shalt.err (!%p204_p1)
}
  0x22   :  { %35 = dma.hbm_to_vmem [thread:$0]  %s326_s1, 256, %s30_s30, [#allocation6], %s237_s25, %s237_s25, %s238_s26  }
  0x23   :  { %230 = dma.done.wait [#allocation3], 256  }
  0x24   :  { %231 = vsyncadd [#allocation3], 4294967040 }
  0x25   :  { %232 = dma.done.wait [#allocation6], 256  }
  0x26   :  { %233 = vsyncadd [#allocation6], 4294967040  ;;  %v50_v0 = vlaneseq  ;;  %v48_v2 = vld [vmem:[#allocation2] sm:$0xff]  ;;  %v95_v3 = vld [vmem:[#allocation5] sm:$0xff]  ;;  %s240_s17 = smov [#allocation7]  }
  0x27   :  { %v49_v4 = vld [vmem:[#allocation2 + $0x8] sm:$0xff]  ;;  %v96_v7 = vld [vmem:[#allocation5 + $0x8] sm:$0xff]  ;;  %v149_v44 = vld [vmem:[%s327_s2] ss:$0 sm:$0xff]  ;;  %s136_s18 = sshll.u32 %s240_s17, 4  ;;  %s137_s18 = int_to_ptr.vmem [resolvable:$true] %s136_s18 }
  0x28   :  { %v51_v1 = vand.u32 127, %v50_v0  ;;  %v150_v50 = vld [vmem:[%s328_s3] ss:$0 sm:$0xff]  ;;  %s208_s2 = scalar_lea.vmem %s137_s18, 256  ;;  %p213_p3 = scmp.lt.s32.totalorder %s137_s18, %s137_s18 }
  0x29   :  { %p209_p2 = scmp.ne.s32.totalorder %s137_s18, %s208_s2  ;;  %p214_p4 = scmp.lt.s32.totalorder %s208_s2, %s208_s2 }
  0x2a   :  { %vm52_vm0 = vcmp.lt.s32.totalorder %v51_v1, 32 }
  0x2b   :  { %v53_v5 = vsel %vm52_vm0, %v48_v2, 0.0  ;;  %v97_v6 = vsel %vm52_vm0, %v95_v3, 0.0  ;;  %v54_v8 = vsel %vm52_vm0, %v49_v4, 0.0  ;;  %v98_v9 = vsel %vm52_vm0, %v96_v7, 0.0  ;;  %p215_p5 = por %p214_p4, %p213_p3 }
  0x2c   :  { %55 = vadd.xlane.f32.xlu0 %v53_v5  ;;  %99 = vadd.xlane.f32.xlu1 %v97_v6 }
  0x2d   :  { %p216_p6 = pnand %p215_p5, %p209_p2 }
  0x30   :  { %57 = vadd.xlane.f32.xlu0 %v54_v8  ;;  %101 = vadd.xlane.f32.xlu1 %v98_v9 }
  0xb9   :  { %v56_v10 = vpop.xlane.xlu0 %55  ;;  %v100_v11 = vpop.xlane.xlu1 %99 }
  0xba   :  { %v59_v12 = vmul.f32 0.03125, %v56_v10  ;;  %v103_v13 = vmul.f32 0.03125, %v100_v11 }
  0xbc   :  { %v61_v14 = vsub.f32 %v53_v5, %v59_v12  ;;  %v105_v15 = vsub.f32 %v97_v6, %v103_v13 }
  0xbd   :  { %v58_v16 = vpop.xlane.xlu0 %57  ;;  %v102_v17 = vpop.xlane.xlu1 %101 }
  0xbe   :  { %v60_v18 = vmul.f32 0.03125, %v58_v16  ;;  %v104_v19 = vmul.f32 0.03125, %v102_v17  ;;  %v63_v20 = vsel %vm52_vm0, %v61_v14, 0.0  ;;  %v107_v21 = vsel %vm52_vm0, %v105_v15, 0.0 }
  0xbf   :  { %v65_v22 = vmul.f32 %v63_v20, %v63_v20  ;;  %v109_v25 = vmul.f32 %v107_v21, %v107_v21 }
  0xc0   :  { %v62_v23 = vsub.f32 %v54_v8, %v60_v18  ;;  %v106_v24 = vsub.f32 %v98_v9, %v104_v19 }
  0xc1   :  { %67 = vadd.xlane.f32.xlu0 %v65_v22 }
  0xc2   :  { %v64_v26 = vsel %vm52_vm0, %v62_v23, 0.0  ;;  %v108_v27 = vsel %vm52_vm0, %v106_v24, 0.0 }
  0xc3   :  { %v66_v28 = vmul.f32 %v64_v26, %v64_v26  ;;  %v110_v29 = vmul.f32 %v108_v27, %v108_v27 }
  0xc5   :  { %111 = vadd.xlane.f32.xlu0 %v109_v25  ;;  %69 = vadd.xlane.f32.xlu1 %v66_v28 }
  0xc9   :  { %113 = vadd.xlane.f32.xlu1 %v110_v29 }
 0x14e   :  { %v68_v30 = vpop.xlane.xlu0 %67 }
 0x14f   :  { %v71_v31 = vmul.f32 0.03125, %v68_v30 }
 0x151   :  { %v73_v32 = vadd.f32 1e-05, %v71_v31 }
 0x152   :  { %v70_v33 = vpop.xlane.xlu1 %69  ;;  %v112_v34 = vpop.xlane.xlu0 %111 }
 0x153   :  { %156 = vrsqrt.f32 %v73_v32  ;;  %v72_v35 = vmul.f32 0.03125, %v70_v33  ;;  %v115_v36 = vmul.f32 0.03125, %v112_v34 }
 0x155   :  { %v74_v37 = vadd.f32 1e-05, %v72_v35  ;;  %v117_v38 = vadd.f32 1e-05, %v115_v36 }
 0x156   :  { %v114_v39 = vpop.xlane.xlu1 %113 }
 0x157   :  { %158 = vrsqrt.f32 %v74_v37  ;;  %v116_v40 = vmul.f32 0.03125, %v114_v39 }
 0x158   :  { %160 = vrsqrt.f32 %v117_v38 }
 0x159   :  { %v118_v41 = vadd.f32 1e-05, %v116_v40 }
 0x15b   :  { %162 = vrsqrt.f32 %v118_v41 }
 0x15d   :  { %v157_v42 = vpop.eup %156 }
 0x15e   :  { %v77_v43 = vmul.f32 %v157_v42, %v63_v20 }
 0x160   :  { %v85_v48 = vmul.f32 %v149_v44, %v77_v43 }
 0x161   :  { %v159_v45 = vpop.eup %158 }
 0x162   :  { %v161_v46 = vpop.eup %160  ;;  %v78_v47 = vmul.f32 %v159_v45, %v64_v26  ;;  %v93_v55 = vadd.f32 %v150_v50, %v85_v48 }
 0x163   :  { %v121_v49 = vmul.f32 %v161_v46, %v107_v21 }
 0x164   :  { %v86_v53 = vmul.f32 %v149_v44, %v78_v47 }
 0x165   :  { %v163_v51 = vpop.eup %162  ;;  %v123_v52 = vmul.f32 %v149_v44, %v121_v49 }
 0x166   :  { %v122_v54 = vmul.f32 %v163_v51, %v108_v27  ;;  %v94_v59 = vadd.f32 %v150_v50, %v86_v53 }
 0x167   :  { %v125_v56 = vadd.f32 %v150_v50, %v123_v52 }
 0x168   :  { %v124_v57 = vmul.f32 %v149_v44, %v122_v54 }
 0x169   :  { %v127_v58 = vadd.f32 %v125_v56, %v93_v55 }
 0x16a   :  { %v126_v60 = vadd.f32 %v150_v50, %v124_v57 }
 0x16b   :  { %129 = vst [vmem:[#allocation7] sm:$0xff] %v127_v58 }
 0x16c   :  { %v128_v61 = vadd.f32 %v126_v60, %v94_v59 }
 0x16e   :  { %130 = vst [vmem:[#allocation7 + $0x8] sm:$0xff] %v128_v61 }
 0x16f   :  { %219 = shalt.err (!%p216_p6)
}
 0x170   :  { %s220_s20 = scalar_lea.hbm %s329_s4, 256 }
 0x171   :  { %p221_p7 = scmp.ne.s32.totalorder %s329_s4, %s220_s20  ;;  %p224_p8 = scmp.lt.u32.totalorder %s220_s20, %s329_s4 }
 0x173   :  { %p226_p9 = pnand %p224_p8, %p221_p7 }
 0x175   :  { %229 = shalt.err (!%p226_p9)
}
 0x176   :  { %142 = dma.vmem_to_hbm [thread:$0]  %s137_s18, 256, %s329_s4, [#allocation4], %s237_s25, %s237_s25, %s238_s26  }
 0x177   :  { %234 = dma.done.wait [#allocation4], 256  }
 0x178   :  { %235 = vsyncadd [#allocation4], 4294967040 }
 0x179   :  { %146 = vsyncpa [#allocation3], 1 }
 0x17a   :  { %147 = vsyncpa [#allocation6], 1 }
 0x17b   :  { %148 = vsyncpa [#allocation4], 1 }

</bundles_post_ra>
